<compile_context>
chip_gen: v7x
topology: tpu7x:2x2x1
jax: 0.10.0
libtpu: 0.0.40
codegen_flags: <defaults>
</compile_context>

<pallas_src>
import math

import jax
import jax.numpy as jnp
from jax.experimental import pallas as pl
from jax.experimental.pallas import tpu as pltpu

_SMALL_BATCH = 512   # <= this: grid-free, whole arrays resident in VMEM
_MAX_TILE_B = 4096   # max rows per batch tile in the gridded path


def mlp_kernel(x_ref, w1_ref, b1_ref, w2_ref, b2_ref, w3_ref, o_ref):
    """Fused Linear -> ReLU -> Linear -> ReLU -> Linear(no bias).

    Weights arrive as bf16 (MXU fast path); accumulation, bias adds and ReLU
    run in f32 on the VPU (pure filler under the tiny MXU workload).
    """
    x = x_ref[...].astype(jnp.bfloat16)
    h = jnp.dot(x, w1_ref[...], preferred_element_type=jnp.float32)
    h = jnp.maximum(h + b1_ref[...], 0.0)                      # (B,H1)+(1,H1)
    h = jnp.dot(h.astype(jnp.bfloat16), w2_ref[...],
                preferred_element_type=jnp.float32)
    h = jnp.maximum(h + b2_ref[...], 0.0)                      # (B,H2)+(1,H2)
    out = jnp.dot(h.astype(jnp.bfloat16), w3_ref[...],
                  preferred_element_type=jnp.float32)
    o_ref[...] = out.astype(o_ref.dtype)                       # direct (B,16) store


def prepare_params(w1, b1, w2, b2, w3):
    """One-time parameter prep, hoisted out of the per-call path:
    bf16 weights for the MXU, f32 biases as (1, out) rows."""
    return (
        w1.astype(jnp.bfloat16),
        jnp.asarray(b1, jnp.float32).reshape(1, -1),
        w2.astype(jnp.bfloat16),
        jnp.asarray(b2, jnp.float32).reshape(1, -1),
        w3.astype(jnp.bfloat16),
    )


def _batch_tile(batch):
    """Pick a batch tile giving an even number (>=2) of tiles, each a multiple
    of 8 sublanes, capped at _MAX_TILE_B rows (megacore-friendly on v7x)."""
    n_tiles = max(2, pl.cdiv(batch, _MAX_TILE_B))
    if n_tiles % 2:
        n_tiles += 1
    return ((pl.cdiv(batch, n_tiles) + 7) // 8) * 8


@jax.jit
def feedforward_nn(x, w1b, b1, w2b, b2, w3b):
    """x: (B, input_size) float32 -> (B, output_size) float32."""
    B, in_size = x.shape
    h1 = w1b.shape[1]
    h2 = w2b.shape[1]
    out_size = w3b.shape[1]
    out_shape = jax.ShapeDtypeStruct((B, out_size), jnp.float32)

    if B <= _SMALL_BATCH:
        # Tiny batch: everything fits in VMEM as whole arrays — no grid, no
        # per-step pipeline bookkeeping.
        vmem = pl.BlockSpec(memory_space=pltpu.MemorySpace.VMEM)
        return pl.pallas_call(
            mlp_kernel,
            out_shape=out_shape,
            in_specs=[vmem] * 6,
            out_specs=vmem,
        )(x, w1b, b1, w2b, b2, w3b)

    # Batched path: tile the batch axis; weights/biases resident in VMEM across
    # the whole grid (index_map always returns block (0, 0)). At tile_b=4096:
    # x tile 512 KiB + out tile 256 KiB (each double-buffered) + <10 KiB weights
    # — well under v5e's 16 MiB scoped default, no vmem_limit_bytes needed.
    tile_b = _batch_tile(B)
    resident = lambda shape: pl.BlockSpec(shape, lambda i: (0, 0))
    return pl.pallas_call(
        mlp_kernel,
        out_shape=out_shape,
        grid=(pl.cdiv(B, tile_b),),
        in_specs=[
            pl.BlockSpec((tile_b, in_size), lambda i: (i, 0)),
            resident((in_size, h1)),
            resident((1, h1)),
            resident((h1, h2)),
            resident((1, h2)),
            resident((h2, out_size)),
        ],
        out_specs=pl.BlockSpec((tile_b, out_size), lambda i: (i, 0)),
        compiler_params=pltpu.CompilerParams(
            # Independent batch tiles -> shard across v7x's 2 TensorCores.
            dimension_semantics=("parallel",),
        ),
    )(x, w1b, b1, w2b, b2, w3b)


def init_linear_params(key, fan_in, fan_out, bias=True):
    """PyTorch nn.Linear default init U(-1/sqrt(fan_in), 1/sqrt(fan_in));
    W returned as (fan_in, fan_out) (transposed for x @ W), bias as (1, fan_out)."""
    bound = 1.0 / math.sqrt(fan_in)
    kw, kb = jax.random.split(key)
    w = jax.random.uniform(kw, (fan_in, fan_out), jnp.float32, -bound, bound)
    if bias:
        b = jax.random.uniform(kb, (1, fan_out), jnp.float32, -bound, bound)
        return w, b
    return w, None


def reference_mlp_f32(x, w1, b1, w2, b2, w3):
    h = jnp.maximum(x @ w1 + b1, 0.0)
    h = jnp.maximum(h @ w2 + b2, 0.0)
    return h @ w3


def reference_mlp_bf16(x, w1, b1, w2, b2, w3):
    """Reference matching the kernel's dtype strategy (bf16 matmul inputs,
    f32 accumulation, f32 bias/ReLU)."""
    bf = jnp.bfloat16
    h = jnp.dot(x.astype(bf), w1.astype(bf), preferred_element_type=jnp.float32)
    h = jnp.maximum(h + b1, 0.0)
    h = jnp.dot(h.astype(bf), w2.astype(bf), preferred_element_type=jnp.float32)
    h = jnp.maximum(h + b2, 0.0)
    return jnp.dot(h.astype(bf), w3.astype(bf),
                   preferred_element_type=jnp.float32)


if __name__ == "__main__":
    batch = 8
    input_size = 32
    hidden_sizes = [64, 32]
    output_size = 16
    # dropout_prob = 0.0 -> the PyTorch module adds no Dropout layers.

    key = jax.random.PRNGKey(0)
    kx, k1, k2, k3 = jax.random.split(key, 4)

    x = jax.random.normal(kx, (batch, input_size), jnp.float32)
    w1, b1 = init_linear_params(k1, input_size, hidden_sizes[0], bias=True)
    w2, b2 = init_linear_params(k2, hidden_sizes[0], hidden_sizes[1], bias=True)
    w3, _ = init_linear_params(k3, hidden_sizes[1], output_size, bias=False)

    # One-time param prep (bf16 weights, f32 bias rows) — hoisted out of the call.
    params = prepare_params(w1, b1, w2, b2, w3)

    # --- Small-batch path: grid-free, fully VMEM-resident ---
    out = jax.block_until_ready(feedforward_nn(x, *params))
    assert out.shape == (batch, output_size)
    assert bool(jnp.all(jnp.isfinite(out)))
    ref_bf16 = reference_mlp_bf16(x, w1, b1, w2, b2, w3)
    assert jnp.allclose(out, ref_bf16, atol=1e-3, rtol=1e-3)
    ref_f32 = reference_mlp_f32(x, w1, b1, w2, b2, w3)
    assert jnp.allclose(out, ref_f32, atol=1e-1, rtol=1e-1)

    # --- Batched path: batch-tiled grid (even tile count >= 2, ragged tail) ---
    big_batch = 1000  # not a multiple of the tile -> exercises clipped last tile
    xb = jax.random.normal(kx, (big_batch, input_size), jnp.float32)
    out_b = jax.block_until_ready(feedforward_nn(xb, *params))
    assert out_b.shape == (big_batch, output_size)
    ref_b = reference_mlp_bf16(xb, w1, b1, w2, b2, w3)
    assert jnp.allclose(out_b, ref_b, atol=1e-3, rtol=1e-3)

    print("KERNEL_OK")
</pallas_src>

<mosaic_0001>
module attributes {stable_mosaic.version = 11 : i64} {
  func.func @mlp_kernel(%arg0: memref<8x32xf32, #tpu.memory_space<vmem>>, %arg1: memref<32x64xbf16, #tpu.memory_space<vmem>>, %arg2: memref<1x64xf32, #tpu.memory_space<vmem>>, %arg3: memref<64x32xbf16, #tpu.memory_space<vmem>>, %arg4: memref<1x32xf32, #tpu.memory_space<vmem>>, %arg5: memref<32x16xbf16, #tpu.memory_space<vmem>>, %arg6: memref<8x16xf32, #tpu.memory_space<vmem>>) attributes {dimension_semantics = [], scalar_prefetch = 0 : i64, scratch_operands = 0 : i64, tpu.core_type = #tpu.core_type<tc>} {
    %c0 = arith.constant 0 : index
    %c0_0 = arith.constant 0 : index
    %0 = vector.load %arg0[%c0, %c0_0] : memref<8x32xf32, #tpu.memory_space<vmem>>, vector<8x32xf32>
    %1 = arith.truncf %0 : vector<8x32xf32> to vector<8x32xbf16>
    %c0_1 = arith.constant 0 : index
    %c0_2 = arith.constant 0 : index
    %2 = vector.load %arg1[%c0_1, %c0_2] : memref<32x64xbf16, #tpu.memory_space<vmem>>, vector<32x64xbf16>
    %cst = arith.constant dense<0.000000e+00> : vector<8x64xf32>
    %3 = tpu.matmul %1, %2, %cst {dimension_numbers = #tpu.dot_dimension_numbers<[1], [0], [0], [1], [0, 0, 1, 1], [], []>} : vector<8x32xbf16>, vector<32x64xbf16>, vector<8x64xf32> -> vector<8x64xf32>
    %c0_3 = arith.constant 0 : index
    %c0_4 = arith.constant 0 : index
    %4 = vector.load %arg2[%c0_3, %c0_4] : memref<1x64xf32, #tpu.memory_space<vmem>>, vector<1x64xf32>
    %5 = vector.broadcast %4 : vector<1x64xf32> to vector<8x64xf32>
    %6 = arith.addf %3, %5 : vector<8x64xf32>
    %cst_5 = arith.constant 0.000000e+00 : f32
    %7 = vector.broadcast %cst_5 : f32 to vector<8x64xf32>
    %8 = arith.maximumf %6, %7 : vector<8x64xf32>
    %9 = arith.truncf %8 : vector<8x64xf32> to vector<8x64xbf16>
    %c0_6 = arith.constant 0 : index
    %c0_7 = arith.constant 0 : index
    %10 = vector.load %arg3[%c0_6, %c0_7] : memref<64x32xbf16, #tpu.memory_space<vmem>>, vector<64x32xbf16>
    %cst_8 = arith.constant dense<0.000000e+00> : vector<8x32xf32>
    %11 = tpu.matmul %9, %10, %cst_8 {dimension_numbers = #tpu.dot_dimension_numbers<[1], [0], [0], [1], [0, 0, 1, 1], [], []>} : vector<8x64xbf16>, vector<64x32xbf16>, vector<8x32xf32> -> vector<8x32xf32>
    %c0_9 = arith.constant 0 : index
    %c0_10 = arith.constant 0 : index
    %12 = vector.load %arg4[%c0_9, %c0_10] : memref<1x32xf32, #tpu.memory_space<vmem>>, vector<1x32xf32>
    %13 = vector.broadcast %12 : vector<1x32xf32> to vector<8x32xf32>
    %14 = arith.addf %11, %13 : vector<8x32xf32>
    %cst_11 = arith.constant 0.000000e+00 : f32
    %15 = vector.broadcast %cst_11 : f32 to vector<8x32xf32>
    %16 = arith.maximumf %14, %15 : vector<8x32xf32>
    %17 = arith.truncf %16 : vector<8x32xf32> to vector<8x32xbf16>
    %c0_12 = arith.constant 0 : index
    %c0_13 = arith.constant 0 : index
    %18 = vector.load %arg5[%c0_12, %c0_13] : memref<32x16xbf16, #tpu.memory_space<vmem>>, vector<32x16xbf16>
    %cst_14 = arith.constant dense<0.000000e+00> : vector<8x16xf32>
    %19 = tpu.matmul %17, %18, %cst_14 {dimension_numbers = #tpu.dot_dimension_numbers<[1], [0], [0], [1], [0, 0, 1, 1], [], []>} : vector<8x32xbf16>, vector<32x16xbf16>, vector<8x16xf32> -> vector<8x16xf32>
    %c0_15 = arith.constant 0 : index
    %c0_16 = arith.constant 0 : index
    %20 = vector.load %arg6[%c0_15, %c0_16] : memref<8x16xf32, #tpu.memory_space<vmem>>, vector<8x16xf32>
    tpu.vector_store %arg6[%c0_15, %c0_16], %19 {strides = array<i32>} : memref<8x16xf32, #tpu.memory_space<vmem>>, vector<8x16xf32>,
    return
  }
}

</mosaic_0001>

<bundles_post_ra>
// kernel: feedforward_nn.1
= control target key start
LH: loop header
LB: loop body
LE: loop exit
PB: predicated region body
PF: predicated region fallthrough
CT: control target
= control target key end

     0   :  { %v343_v1 = vmov 0.0   ;;  %vm344_vm0 = vmmov 0   ;;  %vm50_vm1 = vcmask 261120   ;;  %s431_s0 = inlined_call_operand.vmem [shape: f32[8,32], index: 0, kind: input, shape index: {}]   ;;  %s432_s1 = inlined_call_operand.vmem [shape: bf16[32,64], index: 1, kind: input, shape index: {}]   ;;  %s433_s2 = inlined_call_operand.vmem [shape: f32[1,64], index: 2, kind: input, shape index: {}]   ;;  %s434_s3 = inlined_call_operand.vmem [shape: bf16[64,32], index: 3, kind: input, shape index: {}]   ;;  %s435_s4 = inlined_call_operand.vmem [shape: f32[1,32], index: 4, kind: input, shape index: {}]   ;;  %s436_s5 = inlined_call_operand.vmem [shape: bf16[32,16], index: 5, kind: input, shape index: {}]   ;;  %s437_s6 = inlined_call_operand.hbm [shape: f32[8,16], index: 6, kind: output, shape index: {}]  }
   0x1   :  { %v311_v0 = vld [vmem:[%s432_s1] sm:$0xff]   ;;  %280 = vmatprep.subr.bf16.mxu0 %v343_v1  ;;  %v312_v2 = vld [vmem:[%s432_s1 + $0x8] sm:$0xff]   ;;  %288 = vmatprep.subr.bf16.mxu1 %v343_v1 }
   0x2   :  { %281 = vmatpush3.bf16.msra.mxu0 %v311_v0  ;;  %284 = vmatprep.mubr.msk.bf16.mxu0 %vm344_vm0, %v343_v1  ;;  %v25_v3 = vld [vmem:[%s431_s0] sm:$0xff]  ;;  %v314_v5 = vld [vmem:[%s434_s3 + $0x8] sm:$0xff]  }
   0x3   :  { %282 = vmatprep.subr.bf16.mxu0 %v343_v1  ;;  %v313_v4 = vld [vmem:[%s434_s3] sm:$0xff]   ;;  %296 = vmatprep.mubr.msk.bf16.mxu1 %vm344_vm0, %v343_v1  ;;  %v26_v6 = vpack.c.bf16 %v25_v3, %v25_v3 }
   0x4   :  { %289 = vmatpush3.bf16.msra.mxu1 %v313_v4 }
   0x5   :  { %290 = vmatprep.subr.bf16.mxu1 %v343_v1 }
   0x6   :  { %283 = vmatpush3.bf16.msra.mxu0 %v312_v2 }
   0x7   :  { %300 = vmatprep.subr.bf16.mxu0 %v343_v1 }
   0x8   :  { %11 = vsyncpa [#allocation3], 0  ;;  %291 = vmatpush3.bf16.msra.mxu1 %v314_v5  ;;  %v315_v7 = vld [vmem:[%s434_s3 + $0x10] sm:$0xff]   ;;  %v316_v8 = vld [vmem:[%s434_s3 + $0x18] sm:$0xff]   ;;  %vm135_vm2 = vcmask 523264   ;;  %vm240_vm3 = vcmask 130048  }
   0x9   :  { %285 = vmatmul.mubr.msk.bf16.vlgmr.msra.gmra.mrb[0].mxu0 %vm50_vm1, %v26_v6  ;;  %292 = vmatprep.subr.bf16.mxu1 %v343_v1  ;;  %v317_v9 = vld [vmem:[%s436_s5] sm:$0xff]   ;;  %v318_v18 = vld [vmem:[%s436_s5 + $0x8] sm:$0xff]  }
   0xa   :  { %304 = vmatprep.mubr.msk.bf16.mxu0 %vm344_vm0, %v343_v1  ;;  %301 = vmatpush3.bf16.msra.mxu0 %v317_v9  ;;  %v256_v10 = vld [vmem:[%s433_s2] ss:$0 sm:$0xff]  ;;  %s345_s2 = smov [#allocation2]  }
   0xb   :  { %302 = vmatprep.subr.bf16.mxu0 %v343_v1  ;;  %v260_v19 = vld [vmem:[%s435_s4] ss:$0 sm:$0xff]  ;;  %s248_s16 = sshll.u32 %s345_s2, 4  ;;  %s249_s16 = int_to_ptr.vmem [resolvable:$true] %s248_s16 }
   0xc   :  { %293 = vmatpush3.bf16.msra.mxu1 %v315_v7  ;;  %s319_s5 = scalar_lea.vmem %s249_s16, 128  ;;  %p324_p1 = scmp.lt.s32.totalorder %s249_s16, %s249_s16 }
   0xd   :  { %294 = vmatprep.subr.bf16.mxu1 %v343_v1  ;;  %p320_p0 = scmp.ne.s32.totalorder %s249_s16, %s319_s5  ;;  %p325_p2 = scmp.lt.s32.totalorder %s319_s5, %s319_s5 }
   0xe   :  { %303 = vmatpush3.bf16.msra.mxu0 %v318_v18 }
   0xf   :  { %p326_p3 = por %p325_p2, %p324_p1 }
  0x10   :  { %295 = vmatpush3.bf16.msra.mxu1 %v316_v8 }
  0x11   :  { %p327_p4 = pnand %p326_p3, %p320_p0 }
  0xdc   :  { %v88_v11 = vpop.f32.mrb[0].mxu0 }
  0xdd   :  { %v89_v12 = vadd.f32 %v256_v10, %v88_v11  ;;  %v286_v13 = vpop.f32.mrb[1].mxu0 }
  0xde   :  { %v91_v14 = vpop.f32.mrb[2].mxu0 }
  0xdf   :  { %v94_v15 = vmax.f32 %v89_v12, 0.0  ;;  %v287_v16 = vpop.f32.mrb[3].mxu0 }
  0xe1   :  { %v95_v17 = vpack.c.bf16 %v94_v15, %v94_v15 }
  0xe3   :  { %297 = vmatmul.mubr.msk.bf16.vlgmr.msra.gmra.mrb[0].mxu1 %vm135_vm2, %v95_v17 }
 0x1b6   :  { %v173_v20 = vpop.f32.mrb[0].mxu1 }
 0x1b7   :  { %v174_v21 = vadd.f32 %v260_v19, %v173_v20  ;;  %v298_v22 = vpop.f32.mrb[1].mxu1 }
 0x1b8   :  { %v176_v23 = vpop.f32.mrb[2].mxu1 }
 0x1b9   :  { %v179_v24 = vmax.f32 %v174_v21, 0.0  ;;  %v299_v25 = vpop.f32.mrb[3].mxu1 }
 0x1bb   :  { %v180_v26 = vpack.c.bf16 %v179_v24, %v179_v24 }
 0x1bd   :  { %305 = vmatmul.mubr.msk.bf16.vlgmr.msra.gmra.mrb[4].mxu0 %vm50_vm1, %v180_v26 }
 0x290   :  { %v234_v27 = vpop.f32.mrb[4].mxu0 }
 0x291   :  { %241 = vst.msk [vmem:[#allocation2] sm:$0xff] %vm240_vm3, %v234_v27  ;;  %v306_v28 = vpop.f32.mrb[5].mxu0 }
 0x292   :  { %v237_v29 = vpop.f32.mrb[6].mxu0 }
 0x293   :  { %330 = shalt.err (!%p327_p4)
}
 0x294   :  { %s331_s18 = scalar_lea.hbm %s437_s6, 128 }
 0x295   :  { %p332_p5 = scmp.ne.s32.totalorder %s437_s6, %s331_s18  ;;  %p335_p6 = scmp.lt.u32.totalorder %s331_s18, %s437_s6 }
 0x297   :  { %p337_p7 = pnand %p335_p6, %p332_p5 }
 0x299   :  { %340 = shalt.err (!%p337_p7)
}
 0x29a   :  { %251 = dma.vmem_to_hbm [thread:$0]  %s249_s16, 128, %s437_s6, [#allocation3]   ;;  %v307_v30 = vpop.f32.mrb[7].mxu0 }
 0x29b   :  { %341 = dma.done.wait [#allocation3], 128  }
 0x29c   :  { %342 = vsyncadd [#allocation3], 4294967168 }
 0x29d   :  { %255 = vsyncpa [#allocation3], 1 }

</bundles_post_ra>
